<compile_context>
chip_gen: v6e
topology: v6e:2x2x1
jax: 0.10.0
libtpu: 0.0.40
codegen_flags: <defaults>
</compile_context>

<pallas_src>
import functools

import jax
import jax.numpy as jnp
from jax import lax
from jax.experimental import pallas as pl
from jax.experimental.pallas import tpu as pltpu

EPS = 1e-5
MOMENTUM = 0.01
_LANES = 128


def _round_up(x, m):
    return ((x + m - 1) // m) * m


def _vmem_capacity_bytes():
    """Physical VMEM per core; conservative fallback if the query is unavailable."""
    try:
        return int(pltpu.get_tpu_info().vmem_capacity_bytes)
    except Exception:
        return 64 * 1024 * 1024  # v7x per-core VMEM (the smallest generation)


# ---------------------------------------------------------------------------
# Single-pass kernel: full batch resident per feature tile.
# ---------------------------------------------------------------------------
def _bn_single_pass_kernel(x_ref, params_ref, xnorm_ref, stats_ref,
                           *, eps, momentum, n_rows):
    """One (N, TILE_D) feature tile; the batch reduction is fully inside the tile.

    params_ref: (4, TILE_D) f32 = [gamma; beta; running_mean; running_var]
    stats_ref : (3, TILE_D) f32 = [log-det terms; new_running_mean; new_running_var]
    """
    xf = x_ref[...].astype(jnp.float32)                                       # (N, T)

    # --- batch statistics (reduction over batch axis), in f32 ---
    mu = jnp.mean(xf, axis=0, keepdims=True)                                  # (1, T)
    diff = xf - mu                                                            # (N, T)
    var = jnp.sum(diff * diff, axis=0, keepdims=True) / float(n_rows - 1) + eps

    gamma = params_ref[0:1, :]
    beta = params_ref[1:2, :]
    rmean = params_ref[2:3, :]
    rvar = params_ref[3:4, :]

    # Fused per-feature scale: exp(gamma)/sqrt(sigma) = exp(gamma) * var**(-1/4).
    # exp + rsqrt hit the EUP slot; the N x D hot path is one multiply-add.
    scale = jnp.exp(gamma) * lax.rsqrt(jnp.sqrt(var))

    # Normalize + affine in f32 (reuses f32 diff), cast only at the store.
    xnorm_ref[...] = (diff * scale + beta).astype(xnorm_ref.dtype)

    # Per-feature log-det terms (summed in the wrapper) + running-stat update.
    stats_ref[0:1, :] = gamma - 0.5 * jnp.log(var)          # gamma - log(sigma)
    stats_ref[1:2, :] = rmean * (1.0 - momentum) + momentum * mu
    stats_ref[2:3, :] = rvar * (1.0 - momentum) + momentum * var


# ---------------------------------------------------------------------------
# Two-pass kernels for large N (full-N tile does not fit VMEM).
# ---------------------------------------------------------------------------
def _stats_kernel(x_ref, sums_ref):
    """Accumulate per-feature sum and sum-of-squares across the N grid axis."""
    @pl.when(pl.program_id(1) == 0)
    def _():
        sums_ref[...] = jnp.zeros_like(sums_ref)
    xf = x_ref[...].astype(jnp.float32)                                       # (TN, TD)
    sums_ref[0:1, :] += jnp.sum(xf, axis=0, keepdims=True)
    sums_ref[1:2, :] += jnp.sum(xf * xf, axis=0, keepdims=True)


def _normalize_kernel(x_ref, params_ref, o_ref):
    """params_ref: (3, TILE_D) f32 = [mu; scale; beta]."""
    xf = x_ref[...].astype(jnp.float32)
    mu = params_ref[0:1, :]
    scale = params_ref[1:2, :]
    beta = params_ref[2:3, :]
    o_ref[...] = ((xf - mu) * scale + beta).astype(o_ref.dtype)


# ---------------------------------------------------------------------------
# Tile selection.
# ---------------------------------------------------------------------------
def _pick_tile_d(n, d_pad, itemsize, budget):
    """Largest lane-aligned feature tile whose double-buffered x/x_norm fit the budget.

    Returns None if even a 128-lane full-N tile does not fit (-> two-pass path).
    Caps the tile at d_pad//2 when possible so the grid has >= 2 steps
    (keeps both v7x TensorCores busy; negligible cost on single-TC chips).
    """
    cands = [c for c in range(d_pad, 0, -_LANES) if d_pad % c == 0]
    if d_pad >= 2 * _LANES:
        capped = [c for c in cands if c <= d_pad // 2]
        cands = capped if capped else [_LANES]
    for c in cands:
        if 2 * 2 * n * c * itemsize <= budget:   # x in + x_norm out, double-buffered
            return c
    return None


def _two_pass_tiles(n, d_pad, itemsize, budget):
    """(tile_n, tile_d) for the two-pass path; tile_n multiple of 8, tile_d of 128."""
    tile_d = _LANES
    for c in (512, 256, 128):
        if d_pad % c == 0:
            tile_d = c
            break
    max_tn = max(8, budget // (2 * 2 * tile_d * itemsize))
    tile_n = min(1024, (max_tn // 8) * 8, _round_up(n, 8))
    return max(8, tile_n), tile_d


# ---------------------------------------------------------------------------
# Wrapper.
# ---------------------------------------------------------------------------
def batchnorm_flow_forward(x, gamma, beta, running_mean, running_var,
                           eps=EPS, momentum=MOMENTUM, force_two_pass=False):
    """Training-mode forward of BatchNormLayerWithRunning.

    Returns (x_norm, log_det_sum, new_running_mean, new_running_var).
    """
    n, d = x.shape
    if n < 2:
        raise ValueError("training-mode batch norm needs batch >= 2 (unbiased variance)")

    cap = _vmem_capacity_bytes()
    budget = int(cap * 0.40)       # for the big double-buffered x / x_norm tiles
    vmem_limit = int(cap * 0.55)   # explicit scoped-VMEM limit, ~20% headroom on top
    itemsize = jnp.dtype(x.dtype).itemsize

    # Pad the feature axis to a lane multiple so every block / store is lane-dense.
    d_pad = _round_up(d, _LANES)

    def pad_d(a, value=0.0):
        return a if d_pad == d else jnp.pad(a, ((0, 0), (0, d_pad - d)),
                                            constant_values=value)

    x_p = pad_d(x)
    gamma_f = pad_d(gamma.astype(jnp.float32))
    beta_f = pad_d(beta.astype(jnp.float32))
    rm_f = pad_d(running_mean.astype(jnp.float32))
    rv_f = pad_d(running_var.astype(jnp.float32), value=1.0)

    tile_d = None if force_two_pass else _pick_tile_d(n, d_pad, itemsize, budget)

    if tile_d is not None:
        # ---------------- single-pass: full N per feature tile ----------------
        params = jnp.concatenate([gamma_f, beta_f, rm_f, rv_f], axis=0)   # (4, d_pad)
        kernel = functools.partial(_bn_single_pass_kernel,
                                   eps=eps, momentum=momentum, n_rows=n)
        x_spec = pl.BlockSpec((n, tile_d), lambda j: (0, j))

        x_norm_p, stats = pl.pallas_call(
            kernel,
            out_shape=(jax.ShapeDtypeStruct((n, d_pad), x.dtype),
                       jax.ShapeDtypeStruct((3, d_pad), jnp.float32)),
            grid=(d_pad // tile_d,),
            in_specs=[x_spec,
                      pl.BlockSpec((4, tile_d), lambda j: (0, j))],
            out_specs=(x_spec,
                       pl.BlockSpec((3, tile_d), lambda j: (0, j))),
            compiler_params=pltpu.CompilerParams(
                dimension_semantics=("parallel",),
                vmem_limit_bytes=vmem_limit),
        )(x_p, params)

        x_norm = x_norm_p[:, :d]
        log_det = jnp.sum(stats[0, :d])
        new_rm = stats[1:2, :d]
        new_rv = stats[2:3, :d]
        return x_norm, log_det, new_rm, new_rv

    # ---------------- two-pass: large N (full-N tile does not fit VMEM) --------
    tile_n, tile_d2 = _two_pass_tiles(n, d_pad, itemsize, budget)
    n_pad = _round_up(n, tile_n)
    if n_pad != n:
        # Zero rows contribute 0 to sum and sum-of-squares; padded output rows sliced off.
        x_p = jnp.pad(x_p, ((0, n_pad - n), (0, 0)))

    # Pass 1: per-feature sum / sum-of-squares, N axis last as an "arbitrary" accumulator.
    sums = pl.pallas_call(
        _stats_kernel,
        out_shape=jax.ShapeDtypeStruct((2, d_pad), jnp.float32),
        grid=(d_pad // tile_d2, n_pad // tile_n),
        in_specs=[pl.BlockSpec((tile_n, tile_d2), lambda j, i: (i, j))],
        out_specs=pl.BlockSpec((2, tile_d2), lambda j, i: (0, j)),
        compiler_params=pltpu.CompilerParams(
            dimension_semantics=("parallel", "arbitrary"),
            vmem_limit_bytes=vmem_limit),
    )(x_p)

    # Tiny O(D) stats math in the wrapper (true N, not padded N).
    s = sums[0:1, :]
    sq = sums[1:2, :]
    mu = s / n
    var = (sq - n * mu * mu) / (n - 1) + eps
    scale = jnp.exp(gamma_f) * lax.rsqrt(jnp.sqrt(var))        # exp(gamma) * var**(-1/4)
    params2 = jnp.concatenate([mu, scale, beta_f], axis=0)      # (3, d_pad)

    # Pass 2: normalize + affine on a fully "parallel" (N-tile, D-tile) grid.
    x_norm_p = pl.pallas_call(
        _normalize_kernel,
        out_shape=jax.ShapeDtypeStruct((n_pad, d_pad), x.dtype),
        grid=(n_pad // tile_n, d_pad // tile_d2),
        in_specs=[pl.BlockSpec((tile_n, tile_d2), lambda i, j: (i, j)),
                  pl.BlockSpec((3, tile_d2), lambda i, j: (0, j))],
        out_specs=pl.BlockSpec((tile_n, tile_d2), lambda i, j: (i, j)),
        compiler_params=pltpu.CompilerParams(
            dimension_semantics=("parallel", "parallel"),
            vmem_limit_bytes=vmem_limit),
    )(x_p, params2)

    x_norm = x_norm_p[:n, :d]
    ld_terms = gamma_f - 0.5 * jnp.log(var)
    log_det = jnp.sum(ld_terms[:, :d])
    new_rm = rm_f[:, :d] * (1.0 - momentum) + momentum * mu[:, :d]
    new_rv = rv_f[:, :d] * (1.0 - momentum) + momentum * var[:, :d]
    return x_norm, log_det, new_rm, new_rv


# ---------------------------------------------------------------------------
# Pure-JAX reference mirroring the PyTorch module (training mode).
# ---------------------------------------------------------------------------
def _reference(x, gamma, beta, running_mean, running_var,
               eps=EPS, momentum=MOMENTUM):
    xf = x.astype(jnp.float32)
    n = xf.shape[0]
    mu = jnp.mean(xf, axis=0, keepdims=True)
    var = jnp.sum((xf - mu) ** 2, axis=0, keepdims=True) / (n - 1) + eps
    sigma = jnp.sqrt(var)
    x_norm = (xf - mu) / jnp.sqrt(sigma)
    x_norm = x_norm * jnp.exp(gamma) + beta
    log_det = jnp.sum(gamma) - jnp.sum(jnp.log(sigma))
    # NOTE: the PyTorch module folds +eps into the stored running_var.
    new_rm = running_mean * (1 - momentum) + momentum * mu
    new_rv = running_var * (1 - momentum) + momentum * var
    return x_norm.astype(x.dtype), log_det, new_rm, new_rv


def _check(x, gamma, beta, rm, rv, force_two_pass=False, xn_tol=1e-5, ld_tol=1e-5):
    out = batchnorm_flow_forward(x, gamma, beta, rm, rv, force_two_pass=force_two_pass)
    jax.block_until_ready(out)
    x_norm, log_det, new_rm, new_rv = out
    ref_xn, ref_ld, ref_rm, ref_rv = _reference(x, gamma, beta, rm, rv)
    assert x_norm.shape == x.shape and x_norm.dtype == x.dtype
    assert jnp.allclose(x_norm.astype(jnp.float32), ref_xn.astype(jnp.float32),
                        atol=xn_tol, rtol=xn_tol), "x_norm mismatch"
    assert jnp.allclose(log_det, ref_ld, atol=ld_tol, rtol=ld_tol), "log_det mismatch"
    assert jnp.allclose(new_rm, ref_rm, atol=1e-5, rtol=1e-5), "running_mean mismatch"
    assert jnp.allclose(new_rv, ref_rv, atol=1e-5, rtol=1e-5), "running_var mismatch"


if __name__ == "__main__":
    key = jax.random.PRNGKey(0)
    kx, kg, kb, kx2, kg2, kb2, kx3, kx4 = jax.random.split(key, 8)

    # --- primary small case (batch=8, dim=32); exercises the D->128 lane padding ---
    N, D = 8, 32
    x = jax.random.normal(kx, (N, D), dtype=jnp.float32)
    gamma = 0.1 * jax.random.normal(kg, (1, D), dtype=jnp.float32)
    beta = 0.1 * jax.random.normal(kb, (1, D), dtype=jnp.float32)
    rm = jnp.zeros((1, D), dtype=jnp.float32)
    rv = jnp.ones((1, D), dtype=jnp.float32)
    _check(x, gamma, beta, rm, rv)

    # --- feature-axis grid (D=256 -> 2 tiles of 128 via the >=2-step rule) ---
    N2, D2 = 16, 256
    x2 = jax.random.normal(kx2, (N2, D2), dtype=jnp.float32)
    gamma2 = 0.1 * jax.random.normal(kg2, (1, D2), dtype=jnp.float32)
    beta2 = 0.1 * jax.random.normal(kb2, (1, D2), dtype=jnp.float32)
    rm2 = jnp.zeros((1, D2), dtype=jnp.float32)
    rv2 = jnp.ones((1, D2), dtype=jnp.float32)
    _check(x2, gamma2, beta2, rm2, rv2)

    # --- two-pass (large-N) path validated at small shape via force_two_pass ---
    N3, D3 = 64, 256
    x3 = jax.random.normal(kx3, (N3, D3), dtype=jnp.float32)
    _check(x3, gamma2, beta2, rm2, rv2, force_two_pass=True, xn_tol=1e-4, ld_tol=1e-4)

    # --- bf16 activations (stats still accumulated in f32) ---
    x4 = jax.random.normal(kx4, (N2, D2), dtype=jnp.float32).astype(jnp.bfloat16)
    _check(x4, gamma2, beta2, rm2, rv2, xn_tol=3e-2, ld_tol=1e-3)

    print("KERNEL_OK")
</pallas_src>

<mosaic_0001>
module attributes {stable_mosaic.version = 11 : i64} {
  func.func @_bn_single_pass_kernel(%arg0: i32, %arg1: memref<8x128xf32, #tpu.memory_space<vmem>>, %arg2: memref<4x128xf32, #tpu.memory_space<vmem>>, %arg3: memref<8x128xf32, #tpu.memory_space<vmem>>, %arg4: memref<3x128xf32, #tpu.memory_space<vmem>>) attributes {dimension_semantics = [#tpu.dimension_semantics<parallel>], iteration_bounds = array<i64: 1>, scalar_prefetch = 0 : i64, scratch_operands = 0 : i64, tpu.core_type = #tpu.core_type<tc>, window_params = [{transform_indices = @transform_0, window_bounds = array<i64: 8, 128>}, {transform_indices = @transform_1, window_bounds = array<i64: 4, 128>}, {transform_indices = @transform_2, window_bounds = array<i64: 8, 128>}, {transform_indices = @transform_3, window_bounds = array<i64: 3, 128>}]} {
    %c0 = arith.constant 0 : index
    %c0_0 = arith.constant 0 : index
    %0 = vector.load %arg1[%c0, %c0_0] : memref<8x128xf32, #tpu.memory_space<vmem>>, vector<8x128xf32>
    %cst = arith.constant dense<0.000000e+00> : vector<128xf32>
    %1 = vector.multi_reduction <add>, %0, %cst [0] : vector<8x128xf32> to vector<128xf32>
    %2 = vector.shape_cast %1 : vector<128xf32> to vector<1x128xf32>
    %cst_1 = arith.constant 8.000000e+00 : f32
    %3 = vector.broadcast %cst_1 : f32 to vector<1x128xf32>
    %4 = arith.divf %2, %3 : vector<1x128xf32>
    %5 = vector.broadcast %4 : vector<1x128xf32> to vector<8x128xf32>
    %6 = arith.subf %0, %5 : vector<8x128xf32>
    %7 = arith.mulf %6, %6 : vector<8x128xf32>
    %cst_2 = arith.constant dense<0.000000e+00> : vector<128xf32>
    %8 = vector.multi_reduction <add>, %7, %cst_2 [0] : vector<8x128xf32> to vector<128xf32>
    %9 = vector.shape_cast %8 : vector<128xf32> to vector<1x128xf32>
    %cst_3 = arith.constant 7.000000e+00 : f32
    %10 = vector.broadcast %cst_3 : f32 to vector<1x128xf32>
    %11 = arith.divf %9, %10 : vector<1x128xf32>
    %cst_4 = arith.constant 9.99999974E-6 : f32
    %12 = vector.broadcast %cst_4 : f32 to vector<1x128xf32>
    %13 = arith.addf %11, %12 : vector<1x128xf32>
    %c0_5 = arith.constant 0 : index
    %c0_6 = arith.constant 0 : index
    %14 = vector.load %arg2[%c0_5, %c0_6] : memref<4x128xf32, #tpu.memory_space<vmem>>, vector<1x128xf32>
    %c1 = arith.constant 1 : index
    %c0_7 = arith.constant 0 : index
    %15 = vector.load %arg2[%c1, %c0_7] : memref<4x128xf32, #tpu.memory_space<vmem>>, vector<1x128xf32>
    %c2 = arith.constant 2 : index
    %c0_8 = arith.constant 0 : index
    %16 = vector.load %arg2[%c2, %c0_8] : memref<4x128xf32, #tpu.memory_space<vmem>>, vector<1x128xf32>
    %c3 = arith.constant 3 : index
    %c0_9 = arith.constant 0 : index
    %17 = vector.load %arg2[%c3, %c0_9] : memref<4x128xf32, #tpu.memory_space<vmem>>, vector<1x128xf32>
    %18 = math.exp %14 : vector<1x128xf32>
    %19 = math.sqrt %13 : vector<1x128xf32>
    %20 = math.rsqrt %19 : vector<1x128xf32>
    %21 = arith.mulf %18, %20 : vector<1x128xf32>
    %22 = vector.broadcast %21 : vector<1x128xf32> to vector<8x128xf32>
    %23 = arith.mulf %6, %22 : vector<8x128xf32>
    %24 = vector.broadcast %15 : vector<1x128xf32> to vector<8x128xf32>
    %25 = arith.addf %23, %24 : vector<8x128xf32>
    %c0_10 = arith.constant 0 : index
    %c0_11 = arith.constant 0 : index
    %26 = vector.load %arg3[%c0_10, %c0_11] : memref<8x128xf32, #tpu.memory_space<vmem>>, vector<8x128xf32>
    tpu.vector_store %arg3[%c0_10, %c0_11], %25 {strides = array<i32>} : memref<8x128xf32, #tpu.memory_space<vmem>>, vector<8x128xf32>,
    %27 = math.log %13 : vector<1x128xf32>
    %cst_12 = arith.constant 5.000000e-01 : f32
    %28 = vector.broadcast %cst_12 : f32 to vector<1x128xf32>
    %29 = arith.mulf %28, %27 : vector<1x128xf32>
    %30 = arith.subf %14, %29 : vector<1x128xf32>
    %c0_13 = arith.constant 0 : index
    %c0_14 = arith.constant 0 : index
    %31 = vector.load %arg4[%c0_13, %c0_14] : memref<3x128xf32, #tpu.memory_space<vmem>>, vector<1x128xf32>
    tpu.vector_store %arg4[%c0_13, %c0_14], %30 {strides = array<i32>} : memref<3x128xf32, #tpu.memory_space<vmem>>, vector<1x128xf32>,
    %cst_15 = arith.constant 9.900000e-01 : f32
    %32 = vector.broadcast %cst_15 : f32 to vector<1x128xf32>
    %33 = arith.mulf %16, %32 : vector<1x128xf32>
    %cst_16 = arith.constant 0.00999999977 : f32
    %34 = vector.broadcast %cst_16 : f32 to vector<1x128xf32>
    %35 = arith.mulf %34, %4 : vector<1x128xf32>
    %36 = arith.addf %33, %35 : vector<1x128xf32>
    %c1_17 = arith.constant 1 : index
    %c0_18 = arith.constant 0 : index
    %37 = vector.load %arg4[%c1_17, %c0_18] : memref<3x128xf32, #tpu.memory_space<vmem>>, vector<1x128xf32>
    tpu.vector_store %arg4[%c1_17, %c0_18], %36 {strides = array<i32>} : memref<3x128xf32, #tpu.memory_space<vmem>>, vector<1x128xf32>,
    %cst_19 = arith.constant 9.900000e-01 : f32
    %38 = vector.broadcast %cst_19 : f32 to vector<1x128xf32>
    %39 = arith.mulf %17, %38 : vector<1x128xf32>
    %cst_20 = arith.constant 0.00999999977 : f32
    %40 = vector.broadcast %cst_20 : f32 to vector<1x128xf32>
    %41 = arith.mulf %40, %13 : vector<1x128xf32>
    %42 = arith.addf %39, %41 : vector<1x128xf32>
    %c2_21 = arith.constant 2 : index
    %c0_22 = arith.constant 0 : index
    %43 = vector.load %arg4[%c2_21, %c0_22] : memref<3x128xf32, #tpu.memory_space<vmem>>, vector<1x128xf32>
    tpu.vector_store %arg4[%c2_21, %c0_22], %42 {strides = array<i32>} : memref<3x128xf32, #tpu.memory_space<vmem>>, vector<1x128xf32>,
    return
  }
  func.func @transform_0(%arg0: i32) -> (i32, i32) {
    %c0_i32 = arith.constant 0 : i32
    %c0_i32_0 = arith.constant 0 : i32
    return %c0_i32, %arg0 : i32, i32
  }
  func.func @transform_1(%arg0: i32) -> (i32, i32) {
    %c0_i32 = arith.constant 0 : i32
    %c0_i32_0 = arith.constant 0 : i32
    return %c0_i32, %arg0 : i32, i32
  }
  func.func @transform_2(%arg0: i32) -> (i32, i32) {
    %c0_i32 = arith.constant 0 : i32
    %c0_i32_0 = arith.constant 0 : i32
    return %c0_i32, %arg0 : i32, i32
  }
  func.func @transform_3(%arg0: i32) -> (i32, i32) {
    %c0_i32 = arith.constant 0 : i32
    %c0_i32_0 = arith.constant 0 : i32
    return %c0_i32, %arg0 : i32, i32
  }
}

</mosaic_0001>

<bundles_post_ra>
// kernel: tpu_custom_call.1
= control target key start
LH: loop header
LB: loop body
LE: loop exit
PB: predicated region body
PF: predicated region fallthrough
CT: control target
= control target key end

     0   :  { %9 = vsyncpa [#allocation3], 0  ;;  %s265_s0 = inlined_call_operand.hbm [shape: f32[8,128], index: 0, kind: input, shape index: {}]   ;;  %s266_s1 = inlined_call_operand.hbm [shape: f32[4,128], index: 1, kind: input, shape index: {}]   ;;  %s267_s2 = inlined_call_operand.hbm [shape: f32[8,128], index: 2, kind: output, shape index: {0}]   ;;  %s268_s3 = inlined_call_operand.hbm [shape: f32[3,128], index: 3, kind: output, shape index: {1}]  }
   0x1   :  { %10 = vsyncpa [#allocation6], 0 }
   0x2   :  { %11 = vsyncpa [#allocation4], 0 }
   0x3   :  { %12 = vsyncpa [#allocation9], 0  ;;  %s229_s12 = smov [#allocation2]   ;;  %s230_s14 = smov [#allocation5]  }
   0x4   :  { %s19_s13 = sshll.u32 %s229_s12, 4  ;;  %s29_s15 = sshll.u32 %s230_s14, 4  ;;  %s20_s13 = int_to_ptr.vmem [resolvable:$true] %s19_s13  ;;  %s30_s15 = int_to_ptr.vmem [resolvable:$true] %s29_s15 }
   0x5   :  { %s149_s16 = scalar_lea.vmem %s20_s13, 128  ;;  %p154_p1 = scmp.lt.s32.totalorder %s20_s13, %s20_s13 }
   0x6   :  { %p150_p0 = scmp.ne.s32.totalorder %s20_s13, %s149_s16  ;;  %p155_p2 = scmp.lt.s32.totalorder %s149_s16, %s149_s16 }
   0x8   :  { %p156_p3 = por %p155_p2, %p154_p1 }
   0xa   :  { %p157_p4 = pnand %p156_p3, %p150_p0 }
   0xc   :  { %160 = shalt.err (!%p157_p4)
}
   0xd   :  { %22 = dma.hbm_to_vmem [thread:$0]  %s265_s0, 128, %s20_s13, [#allocation3]  }
   0xe   :  { %s169_s19 = scalar_lea.vmem %s30_s15, 64  ;;  %p174_p6 = scmp.lt.s32.totalorder %s30_s15, %s30_s15 }
   0xf   :  { %p170_p5 = scmp.ne.s32.totalorder %s30_s15, %s169_s19  ;;  %p175_p7 = scmp.lt.s32.totalorder %s169_s19, %s169_s19 }
  0x11   :  { %p176_p8 = por %p175_p7, %p174_p6 }
  0x13   :  { %p177_p9 = pnand %p176_p8, %p170_p5 }
  0x15   :  { %180 = shalt.err (!%p177_p9)
}
  0x16   :  { %32 = dma.hbm_to_vmem [thread:$0]  %s266_s1, 64, %s30_s15, [#allocation6]  }
  0x17   :  { %221 = dma.done.wait [#allocation3], 128  }
  0x18   :  { %222 = vsyncadd [#allocation3], 4294967168 }
  0x19   :  { %223 = dma.done.wait [#allocation6], 64  }
  0x1a   :  { %224 = vsyncadd [#allocation6], 4294967232  ;;  %v39_v0 = vld [vmem:[#allocation2] sm:$0xff]  ;;  %v61_v6 = vld [vmem:[#allocation5 + $0x2] sm:$0x1]  ;;  %s231_s0 = smov [#allocation8]   ;;  %v74_v37 = vlaneseq }
  0x1b   :  { %v40_v1 = vrot.slane %v39_v0, 4  ;;  %v90_v9 = vmul.f32 0.99, %v61_v6  ;;  %v62_v21 = vld [vmem:[#allocation5 + $0x3] sm:$0x1]  ;;  %s114_s1 = sshll.u32 %s231_s0, 4  ;;  %s115_s1 = int_to_ptr.vmem [resolvable:$true] %s114_s1 }
  0x1c   :  { %v94_v23 = vmul.f32 0.99, %v62_v21  ;;  %v59_v26 = vld [vmem:[#allocation5] sm:$0x1]  ;;  %s181_s22 = scalar_lea.vmem %s115_s1, 64  ;;  %p186_p11 = scmp.lt.s32.totalorder %s115_s1, %s115_s1 }
  0x1d   :  { %v41_v2 = vadd.f32 %v40_v1, %v39_v0  ;;  %v63_v27 = vmul.f32 1.442695, %v59_v26  ;;  %p182_p10 = scmp.ne.s32.totalorder %s115_s1, %s181_s22  ;;  %p187_p12 = scmp.lt.s32.totalorder %s181_s22, %s181_s22 }
  0x1f   :  { %v42_v3 = vrot.slane %v41_v2, 2  ;;  %p188_p13 = por %p187_p12, %p186_p11 }
  0x21   :  { %v43_v4 = vadd.f32 %v42_v3, %v41_v2  ;;  %p189_p0 = pnand %p188_p13, %p182_p10 }
  0x23   :  { %v44_v5 = vrot.slane %v43_v4, 1 }
  0x25   :  { %v45_v7 = vadd.f32 %v44_v5, %v43_v4 }
  0x27   :  { %v47_v8 = vmul.f32 0.125, %v45_v7 }
  0x29   :  { %v48_v10 = vsub.f32 %v39_v0, %v47_v8  ;;  %v91_v11 = vmul.f32 0.01, %v47_v8 }
  0x2b   :  { %v49_v12 = vmul.f32 %v48_v10, %v48_v10  ;;  %v92_v13 = vadd.f32 %v91_v11, %v90_v9 }
  0x2d   :  { %v50_v14 = vrot.slane %v49_v12, 4  ;;  %93 = vst [vmem:[#allocation8 + $0x1] sm:$0x1] %v92_v13 }
  0x2f   :  { %v51_v15 = vadd.f32 %v50_v14, %v49_v12 }
  0x31   :  { %v52_v16 = vrot.slane %v51_v15, 2 }
  0x33   :  { %v53_v17 = vadd.f32 %v52_v16, %v51_v15 }
  0x35   :  { %v54_v18 = vrot.slane %v53_v17, 1 }
  0x37   :  { %v55_v19 = vadd.f32 %v54_v18, %v53_v17 }
  0x39   :  { %v57_v20 = vmul.f32 0.14285715, %v55_v19 }
  0x3b   :  { %v58_v22 = vadd.f32 1e-05, %v57_v20 }
  0x3d   :  { %133 = vrsqrt.f32 %v58_v22  ;;  %v95_v24 = vmul.f32 0.01, %v58_v22  ;;  %vm67_vm0 = vcmp.eq.f32.partialorder %v58_v22, inf  ;;  %v70_v29 = vand.u32 2147483648, %v58_v22 }
  0x3e   :  { %135 = vlog2.f32 %v58_v22  ;;  %vm69_vm1 = vcmp.eq.f32.partialorder %v58_v22, 0.0 }
  0x3f   :  { %v96_v25 = vadd.f32 %v95_v24, %v94_v23  ;;  %137 = vpow2.f32 %v63_v27 }
  0x41   :  { %97 = vst [vmem:[#allocation8 + $0x2] sm:$0x1] %v96_v25 }
  0x4a   :  { %v134_v28 = vpop.eup %133 }
  0x4b   :  { %v136_v30 = vpop.eup %135  ;;  %v66_v31 = vmul.f32 %v134_v28, %v58_v22 }
  0x4c   :  { %v86_v32 = vmul.f32 0.6931472, %v136_v30 }
  0x4d   :  { %v68_v33 = vsel %vm67_vm0, %v58_v22, %v66_v31 }
  0x4e   :  { %v71_v34 = vsel %vm69_vm1, %v70_v29, %v68_v33  ;;  %v87_v35 = vmul.f32 0.5, %v86_v32 }
  0x4f   :  { %139 = vrsqrt.f32 %v71_v34 }
  0x50   :  { %v88_v36 = vsub.f32 %v59_v26, %v87_v35 }
  0x52   :  { %89 = vst [vmem:[#allocation8] sm:$0x1] %v88_v36 }
  0x53   :  { %192 = shalt.err (!%p189_p0)
}
  0x54   :  { %117 = dma.vmem_to_hbm [thread:$0]  %s115_s1, 64, %s268_s3, [#allocation9]   ;;  %v75_v38 = vshrl.u32 %v74_v37, 7  ;;  %v138_v39 = vpop.eup %137  ;;  %v128_v44 = vld [vmem:[#allocation5 + $0x1] ss:$0 sm:$0xff] }
  0x55   :  { %s232_s25 = smov [#allocation7]  }
  0x56   :  { %v76_v40 = vsub.s32 0, %v75_v38  ;;  %s104_s26 = sshll.u32 %s232_s25, 4  ;;  %s105_s26 = int_to_ptr.vmem [resolvable:$true] %s104_s26 }
  0x57   :  { %s201_s27 = scalar_lea.vmem %s105_s26, 128  ;;  %p206_p2 = scmp.lt.s32.totalorder %s105_s26, %s105_s26 }
  0x58   :  { %p202_p1 = scmp.ne.s32.totalorder %s105_s26, %s201_s27  ;;  %p207_p3 = scmp.lt.s32.totalorder %s201_s27, %s201_s27 }
  0x5a   :  { %p208_p4 = por %p207_p3, %p206_p2 }
  0x5c   :  { %v140_v41 = vpop.eup %139  ;;  %p209_p5 = pnand %p208_p4, %p202_p1 }
  0x5d   :  { %v73_v42 = vmul.f32 %v140_v41, %v138_v39 }
  0x5f   :  { %v77_v43 = vrot.slane %v73_v42, %v76_v40 }
  0x61   :  { %v78_v45 = vmul.f32 %v77_v43, %v48_v10 }
  0x63   :  { %v83_v46 = vadd.f32 %v128_v44, %v78_v45 }
  0x65   :  { %84 = vst [vmem:[#allocation7] sm:$0xff] %v83_v46 }
  0x66   :  { %212 = shalt.err (!%p209_p5)
}
  0x67   :  { %107 = dma.vmem_to_hbm [thread:$0]  %s105_s26, 128, %s267_s2, [#allocation4]  }
  0x68   :  { %225 = dma.done.wait [#allocation4], 128  }
  0x69   :  { %226 = vsyncadd [#allocation4], 4294967168 }
  0x6a   :  { %227 = dma.done.wait [#allocation9], 64  }
  0x6b   :  { %228 = vsyncadd [#allocation9], 4294967232 }
  0x6c   :  { %124 = vsyncpa [#allocation3], 1 }
  0x6d   :  { %125 = vsyncpa [#allocation6], 1 }
  0x6e   :  { %126 = vsyncpa [#allocation4], 1 }
  0x6f   :  { %127 = vsyncpa [#allocation9], 1 }

</bundles_post_ra>
